<compile_context>
chip_gen: v7x
topology: tpu7x:2x2x1
jax: 0.10.0
libtpu: 0.0.40
codegen_flags: <defaults>
</compile_context>

<pallas_src>
import jax
import jax.numpy as jnp
from jax.experimental import pallas as pl
from jax.experimental.pallas import tpu as pltpu

X_DIM = 100                     # generator latent features
Y_DIM = 4                       # conditioning features
IN_DIM = X_DIM + Y_DIM          # 104 = linear1 in_features
HIDDEN = 600                    # linear1 out_features
CH = 6                          # channels after reshape
CH_DIM = HIDDEN // CH           # 100 = expand in_features
OUT_DIM = 200                   # expand out_features


def _silu(v):
    # x * sigmoid(x) == x / (1 + exp(-x)); exact, matches jax.nn.silu numerics.
    return v / (1.0 + jnp.exp(-v))


def _gen_kernel(xy_ref, w1_ref, w2p_ref, out_ref):
    """Fused forward, single block.

    xy_ref : [B, IN_DIM+1]            x ++ y ++ 1   (ones column folds b1 into W1)
    w1_ref : [CH, IN_DIM+1, CH_DIM]   per-channel slabs of [W1^T ; b1]
    w2p_ref: [CH_DIM+1, OUT_DIM]      packed [W2^T ; b2]  (one operand, one DMA)
    out_ref: [CH, B, OUT_DIM]         channel-major; wrapper transposes to [B, CH, OUT_DIM]
    """
    xy = xy_ref[...]                         # [B, 105]
    w2t = w2p_ref[:CH_DIM, :]                # [100, 200]
    b2 = w2p_ref[CH_DIM:, :]                 # [1, 200]
    for c in range(CH):                      # static unroll (CH = 6)
        h = jnp.dot(xy, w1_ref[c], preferred_element_type=jnp.float32)     # [B, 100]
        h = _silu(h)
        out_ref[c] = jnp.dot(h, w2t, preferred_element_type=jnp.float32) + b2


def init_params(key):
    ks = jax.random.split(key, 4)
    w1 = jax.random.normal(ks[0], (HIDDEN, IN_DIM), jnp.float32) * 0.1   # torch Linear: [out, in]
    b1 = jax.random.normal(ks[1], (HIDDEN,), jnp.float32) * 0.1
    w2 = jax.random.normal(ks[2], (OUT_DIM, CH_DIM), jnp.float32) * 0.1
    b2 = jax.random.normal(ks[3], (OUT_DIM,), jnp.float32) * 0.1
    return w1, b1, w2, b2


def conditional_generator(x, y, params):
    w1, b1, w2, b2 = params
    B = x.shape[0]

    # ---- cheap wrapper prep: only concat / transpose / reshape of tiny weights ----
    ones = jnp.ones((B, 1), jnp.float32)
    xy_aug = jnp.concatenate(
        [x.astype(jnp.float32), y.astype(jnp.float32), ones], axis=1)        # [B, 105]

    # Fold b1 into W1 (via the ones column) and split into per-channel slabs so
    # the kernel never slices the hidden vector at unaligned lane offsets.
    w1_aug = jnp.concatenate(
        [w1.T.astype(jnp.float32), b1[None, :].astype(jnp.float32)], axis=0)  # [105, 600]
    w1_slabs = jnp.transpose(
        w1_aug.reshape(IN_DIM + 1, CH, CH_DIM), (1, 0, 2))                    # [6, 105, 100]

    # Pack W2^T and b2 into a single operand (fewer tiny HBM->VMEM DMAs).
    w2_pack = jnp.concatenate(
        [w2.T.astype(jnp.float32), b2[None, :].astype(jnp.float32)], axis=0)  # [101, 200]

    vmem = pl.BlockSpec(memory_space=pltpu.MemorySpace.VMEM)
    out_cbn = pl.pallas_call(
        _gen_kernel,
        out_shape=jax.ShapeDtypeStruct((CH, B, OUT_DIM), jnp.float32),
        in_specs=[vmem, vmem, vmem],
        out_specs=vmem,
    )(xy_aug, w1_slabs, w2_pack)
    return jnp.transpose(out_cbn, (1, 0, 2))                                  # [B, 6, 200]


def reference_forward(x, y, params):
    w1, b1, w2, b2 = params
    xy = jnp.concatenate([x, y], axis=1)
    h = jax.nn.silu(jnp.dot(xy, w1.T, precision=jax.lax.Precision.HIGHEST) + b1)
    h3 = h.reshape(x.shape[0], CH, CH_DIM)
    return jnp.einsum('bck,nk->bcn', h3, w2,
                      precision=jax.lax.Precision.HIGHEST) + b2


if __name__ == "__main__":
    key = jax.random.PRNGKey(0)
    kx, ky, kp = jax.random.split(key, 3)

    B = 2
    x = jax.random.normal(kx, (B, X_DIM), jnp.float32)
    y = jax.random.normal(ky, (B, Y_DIM), jnp.float32)
    params = init_params(kp)

    out = conditional_generator(x, y, params)
    out = jax.block_until_ready(out)

    ref = reference_forward(x, y, params)
    assert out.shape == (B, CH, OUT_DIM), out.shape
    assert jnp.allclose(out, ref, rtol=1e-4, atol=1e-4), (out, ref)
    print("KERNEL_OK")
</pallas_src>

<mosaic_0001>
module attributes {stable_mosaic.version = 11 : i64} {
  func.func @_gen_kernel(%arg0: memref<2x105xf32, #tpu.memory_space<vmem>>, %arg1: memref<6x105x100xf32, #tpu.memory_space<vmem>>, %arg2: memref<101x200xf32, #tpu.memory_space<vmem>>, %arg3: memref<6x2x200xf32, #tpu.memory_space<vmem>>) attributes {dimension_semantics = [], scalar_prefetch = 0 : i64, scratch_operands = 0 : i64, tpu.core_type = #tpu.core_type<tc>} {
    %c0 = arith.constant 0 : index
    %c0_0 = arith.constant 0 : index
    %0 = vector.load %arg0[%c0, %c0_0] : memref<2x105xf32, #tpu.memory_space<vmem>>, vector<2x105xf32>
    %c0_1 = arith.constant 0 : index
    %c0_2 = arith.constant 0 : index
    %1 = vector.load %arg2[%c0_1, %c0_2] : memref<101x200xf32, #tpu.memory_space<vmem>>, vector<100x200xf32>
    %c100 = arith.constant 100 : index
    %c0_3 = arith.constant 0 : index
    %2 = vector.load %arg2[%c100, %c0_3] : memref<101x200xf32, #tpu.memory_space<vmem>>, vector<1x200xf32>
    %c0_4 = arith.constant 0 : index
    %c0_5 = arith.constant 0 : index
    %c0_6 = arith.constant 0 : index
    %3 = vector.load %arg1[%c0_4, %c0_5, %c0_6] : memref<6x105x100xf32, #tpu.memory_space<vmem>>, vector<1x105x100xf32>
    %4 = vector.shape_cast %3 : vector<1x105x100xf32> to vector<105x100xf32>
    %cst = arith.constant dense<0.000000e+00> : vector<2x100xf32>
    %5 = tpu.matmul %0, %4, %cst {dimension_numbers = #tpu.dot_dimension_numbers<[1], [0], [0], [1], [0, 0, 1, 1], [], []>} : vector<2x105xf32>, vector<105x100xf32>, vector<2x100xf32> -> vector<2x100xf32>
    %cst_7 = arith.constant 0.000000e+00 : f32
    %6 = vector.broadcast %cst_7 : f32 to vector<2x100xf32>
    %7 = arith.subf %6, %5 : vector<2x100xf32>
    %8 = math.exp %7 : vector<2x100xf32>
    %cst_8 = arith.constant 1.000000e+00 : f32
    %9 = vector.broadcast %cst_8 : f32 to vector<2x100xf32>
    %10 = arith.addf %9, %8 : vector<2x100xf32>
    %11 = arith.divf %5, %10 : vector<2x100xf32>
    %cst_9 = arith.constant dense<0.000000e+00> : vector<2x200xf32>
    %12 = tpu.matmul %11, %1, %cst_9 {dimension_numbers = #tpu.dot_dimension_numbers<[1], [0], [0], [1], [0, 0, 1, 1], [], []>} : vector<2x100xf32>, vector<100x200xf32>, vector<2x200xf32> -> vector<2x200xf32>
    %13 = vector.broadcast %2 : vector<1x200xf32> to vector<2x200xf32>
    %14 = arith.addf %12, %13 : vector<2x200xf32>
    %c0_10 = arith.constant 0 : index
    %c0_11 = arith.constant 0 : index
    %c0_12 = arith.constant 0 : index
    %15 = vector.load %arg3[%c0_10, %c0_11, %c0_12] : memref<6x2x200xf32, #tpu.memory_space<vmem>>, vector<1x2x200xf32>
    %16 = vector.shape_cast %15 : vector<1x2x200xf32> to vector<2x200xf32>
    %17 = vector.shape_cast %14 : vector<2x200xf32> to vector<1x2x200xf32>
    tpu.vector_store %arg3[%c0_10, %c0_11, %c0_12], %17 {strides = array<i32>} : memref<6x2x200xf32, #tpu.memory_space<vmem>>, vector<1x2x200xf32>,
    %c1 = arith.constant 1 : index
    %c0_13 = arith.constant 0 : index
    %c0_14 = arith.constant 0 : index
    %18 = vector.load %arg1[%c1, %c0_13, %c0_14] : memref<6x105x100xf32, #tpu.memory_space<vmem>>, vector<1x105x100xf32>
    %19 = vector.shape_cast %18 : vector<1x105x100xf32> to vector<105x100xf32>
    %cst_15 = arith.constant dense<0.000000e+00> : vector<2x100xf32>
    %20 = tpu.matmul %0, %19, %cst_15 {dimension_numbers = #tpu.dot_dimension_numbers<[1], [0], [0], [1], [0, 0, 1, 1], [], []>} : vector<2x105xf32>, vector<105x100xf32>, vector<2x100xf32> -> vector<2x100xf32>
    %cst_16 = arith.constant 0.000000e+00 : f32
    %21 = vector.broadcast %cst_16 : f32 to vector<2x100xf32>
    %22 = arith.subf %21, %20 : vector<2x100xf32>
    %23 = math.exp %22 : vector<2x100xf32>
    %cst_17 = arith.constant 1.000000e+00 : f32
    %24 = vector.broadcast %cst_17 : f32 to vector<2x100xf32>
    %25 = arith.addf %24, %23 : vector<2x100xf32>
    %26 = arith.divf %20, %25 : vector<2x100xf32>
    %cst_18 = arith.constant dense<0.000000e+00> : vector<2x200xf32>
    %27 = tpu.matmul %26, %1, %cst_18 {dimension_numbers = #tpu.dot_dimension_numbers<[1], [0], [0], [1], [0, 0, 1, 1], [], []>} : vector<2x100xf32>, vector<100x200xf32>, vector<2x200xf32> -> vector<2x200xf32>
    %28 = vector.broadcast %2 : vector<1x200xf32> to vector<2x200xf32>
    %29 = arith.addf %27, %28 : vector<2x200xf32>
    %c1_19 = arith.constant 1 : index
    %c0_20 = arith.constant 0 : index
    %c0_21 = arith.constant 0 : index
    %30 = vector.load %arg3[%c1_19, %c0_20, %c0_21] : memref<6x2x200xf32, #tpu.memory_space<vmem>>, vector<1x2x200xf32>
    %31 = vector.shape_cast %30 : vector<1x2x200xf32> to vector<2x200xf32>
    %32 = vector.shape_cast %29 : vector<2x200xf32> to vector<1x2x200xf32>
    tpu.vector_store %arg3[%c1_19, %c0_20, %c0_21], %32 {strides = array<i32>} : memref<6x2x200xf32, #tpu.memory_space<vmem>>, vector<1x2x200xf32>,
    %c2 = arith.constant 2 : index
    %c0_22 = arith.constant 0 : index
    %c0_23 = arith.constant 0 : index
    %33 = vector.load %arg1[%c2, %c0_22, %c0_23] : memref<6x105x100xf32, #tpu.memory_space<vmem>>, vector<1x105x100xf32>
    %34 = vector.shape_cast %33 : vector<1x105x100xf32> to vector<105x100xf32>
    %cst_24 = arith.constant dense<0.000000e+00> : vector<2x100xf32>
    %35 = tpu.matmul %0, %34, %cst_24 {dimension_numbers = #tpu.dot_dimension_numbers<[1], [0], [0], [1], [0, 0, 1, 1], [], []>} : vector<2x105xf32>, vector<105x100xf32>, vector<2x100xf32> -> vector<2x100xf32>
    %cst_25 = arith.constant 0.000000e+00 : f32
    %36 = vector.broadcast %cst_25 : f32 to vector<2x100xf32>
    %37 = arith.subf %36, %35 : vector<2x100xf32>
    %38 = math.exp %37 : vector<2x100xf32>
    %cst_26 = arith.constant 1.000000e+00 : f32
    %39 = vector.broadcast %cst_26 : f32 to vector<2x100xf32>
    %40 = arith.addf %39, %38 : vector<2x100xf32>
    %41 = arith.divf %35, %40 : vector<2x100xf32>
    %cst_27 = arith.constant dense<0.000000e+00> : vector<2x200xf32>
    %42 = tpu.matmul %41, %1, %cst_27 {dimension_numbers = #tpu.dot_dimension_numbers<[1], [0], [0], [1], [0, 0, 1, 1], [], []>} : vector<2x100xf32>, vector<100x200xf32>, vector<2x200xf32> -> vector<2x200xf32>
    %43 = vector.broadcast %2 : vector<1x200xf32> to vector<2x200xf32>
    %44 = arith.addf %42, %43 : vector<2x200xf32>
    %c2_28 = arith.constant 2 : index
    %c0_29 = arith.constant 0 : index
    %c0_30 = arith.constant 0 : index
    %45 = vector.load %arg3[%c2_28, %c0_29, %c0_30] : memref<6x2x200xf32, #tpu.memory_space<vmem>>, vector<1x2x200xf32>
    %46 = vector.shape_cast %45 : vector<1x2x200xf32> to vector<2x200xf32>
    %47 = vector.shape_cast %44 : vector<2x200xf32> to vector<1x2x200xf32>
    tpu.vector_store %arg3[%c2_28, %c0_29, %c0_30], %47 {strides = array<i32>} : memref<6x2x200xf32, #tpu.memory_space<vmem>>, vector<1x2x200xf32>,
    %c3 = arith.constant 3 : index
    %c0_31 = arith.constant 0 : index
    %c0_32 = arith.constant 0 : index
    %48 = vector.load %arg1[%c3, %c0_31, %c0_32] : memref<6x105x100xf32, #tpu.memory_space<vmem>>, vector<1x105x100xf32>
    %49 = vector.shape_cast %48 : vector<1x105x100xf32> to vector<105x100xf32>
    %cst_33 = arith.constant dense<0.000000e+00> : vector<2x100xf32>
    %50 = tpu.matmul %0, %49, %cst_33 {dimension_numbers = #tpu.dot_dimension_numbers<[1], [0], [0], [1], [0, 0, 1, 1], [], []>} : vector<2x105xf32>, vector<105x100xf32>, vector<2x100xf32> -> vector<2x100xf32>
    %cst_34 = arith.constant 0.000000e+00 : f32
    %51 = vector.broadcast %cst_34 : f32 to vector<2x100xf32>
    %52 = arith.subf %51, %50 : vector<2x100xf32>
    %53 = math.exp %52 : vector<2x100xf32>
    %cst_35 = arith.constant 1.000000e+00 : f32
    %54 = vector.broadcast %cst_35 : f32 to vector<2x100xf32>
    %55 = arith.addf %54, %53 : vector<2x100xf32>
    %56 = arith.divf %50, %55 : vector<2x100xf32>
    %cst_36 = arith.constant dense<0.000000e+00> : vector<2x200xf32>
    %57 = tpu.matmul %56, %1, %cst_36 {dimension_numbers = #tpu.dot_dimension_numbers<[1], [0], [0], [1], [0, 0, 1, 1], [], []>} : vector<2x100xf32>, vector<100x200xf32>, vector<2x200xf32> -> vector<2x200xf32>
    %58 = vector.broadcast %2 : vector<1x200xf32> to vector<2x200xf32>
    %59 = arith.addf %57, %58 : vector<2x200xf32>
    %c3_37 = arith.constant 3 : index
    %c0_38 = arith.constant 0 : index
    %c0_39 = arith.constant 0 : index
    %60 = vector.load %arg3[%c3_37, %c0_38, %c0_39] : memref<6x2x200xf32, #tpu.memory_space<vmem>>, vector<1x2x200xf32>
    %61 = vector.shape_cast %60 : vector<1x2x200xf32> to vector<2x200xf32>
    %62 = vector.shape_cast %59 : vector<2x200xf32> to vector<1x2x200xf32>
    tpu.vector_store %arg3[%c3_37, %c0_38, %c0_39], %62 {strides = array<i32>} : memref<6x2x200xf32, #tpu.memory_space<vmem>>, vector<1x2x200xf32>,
    %c4 = arith.constant 4 : index
    %c0_40 = arith.constant 0 : index
    %c0_41 = arith.constant 0 : index
    %63 = vector.load %arg1[%c4, %c0_40, %c0_41] : memref<6x105x100xf32, #tpu.memory_space<vmem>>, vector<1x105x100xf32>
    %64 = vector.shape_cast %63 : vector<1x105x100xf32> to vector<105x100xf32>
    %cst_42 = arith.constant dense<0.000000e+00> : vector<2x100xf32>
    %65 = tpu.matmul %0, %64, %cst_42 {dimension_numbers = #tpu.dot_dimension_numbers<[1], [0], [0], [1], [0, 0, 1, 1], [], []>} : vector<2x105xf32>, vector<105x100xf32>, vector<2x100xf32> -> vector<2x100xf32>
    %cst_43 = arith.constant 0.000000e+00 : f32
    %66 = vector.broadcast %cst_43 : f32 to vector<2x100xf32>
    %67 = arith.subf %66, %65 : vector<2x100xf32>
    %68 = math.exp %67 : vector<2x100xf32>
    %cst_44 = arith.constant 1.000000e+00 : f32
    %69 = vector.broadcast %cst_44 : f32 to vector<2x100xf32>
    %70 = arith.addf %69, %68 : vector<2x100xf32>
    %71 = arith.divf %65, %70 : vector<2x100xf32>
    %cst_45 = arith.constant dense<0.000000e+00> : vector<2x200xf32>
    %72 = tpu.matmul %71, %1, %cst_45 {dimension_numbers = #tpu.dot_dimension_numbers<[1], [0], [0], [1], [0, 0, 1, 1], [], []>} : vector<2x100xf32>, vector<100x200xf32>, vector<2x200xf32> -> vector<2x200xf32>
    %73 = vector.broadcast %2 : vector<1x200xf32> to vector<2x200xf32>
    %74 = arith.addf %72, %73 : vector<2x200xf32>
    %c4_46 = arith.constant 4 : index
    %c0_47 = arith.constant 0 : index
    %c0_48 = arith.constant 0 : index
    %75 = vector.load %arg3[%c4_46, %c0_47, %c0_48] : memref<6x2x200xf32, #tpu.memory_space<vmem>>, vector<1x2x200xf32>
    %76 = vector.shape_cast %75 : vector<1x2x200xf32> to vector<2x200xf32>
    %77 = vector.shape_cast %74 : vector<2x200xf32> to vector<1x2x200xf32>
    tpu.vector_store %arg3[%c4_46, %c0_47, %c0_48], %77 {strides = array<i32>} : memref<6x2x200xf32, #tpu.memory_space<vmem>>, vector<1x2x200xf32>,
    %c5 = arith.constant 5 : index
    %c0_49 = arith.constant 0 : index
    %c0_50 = arith.constant 0 : index
    %78 = vector.load %arg1[%c5, %c0_49, %c0_50] : memref<6x105x100xf32, #tpu.memory_space<vmem>>, vector<1x105x100xf32>
    %79 = vector.shape_cast %78 : vector<1x105x100xf32> to vector<105x100xf32>
    %cst_51 = arith.constant dense<0.000000e+00> : vector<2x100xf32>
    %80 = tpu.matmul %0, %79, %cst_51 {dimension_numbers = #tpu.dot_dimension_numbers<[1], [0], [0], [1], [0, 0, 1, 1], [], []>} : vector<2x105xf32>, vector<105x100xf32>, vector<2x100xf32> -> vector<2x100xf32>
    %cst_52 = arith.constant 0.000000e+00 : f32
    %81 = vector.broadcast %cst_52 : f32 to vector<2x100xf32>
    %82 = arith.subf %81, %80 : vector<2x100xf32>
    %83 = math.exp %82 : vector<2x100xf32>
    %cst_53 = arith.constant 1.000000e+00 : f32
    %84 = vector.broadcast %cst_53 : f32 to vector<2x100xf32>
    %85 = arith.addf %84, %83 : vector<2x100xf32>
    %86 = arith.divf %80, %85 : vector<2x100xf32>
    %cst_54 = arith.constant dense<0.000000e+00> : vector<2x200xf32>
    %87 = tpu.matmul %86, %1, %cst_54 {dimension_numbers = #tpu.dot_dimension_numbers<[1], [0], [0], [1], [0, 0, 1, 1], [], []>} : vector<2x100xf32>, vector<100x200xf32>, vector<2x200xf32> -> vector<2x200xf32>
    %88 = vector.broadcast %2 : vector<1x200xf32> to vector<2x200xf32>
    %89 = arith.addf %87, %88 : vector<2x200xf32>
    %c5_55 = arith.constant 5 : index
    %c0_56 = arith.constant 0 : index
    %c0_57 = arith.constant 0 : index
    %90 = vector.load %arg3[%c5_55, %c0_56, %c0_57] : memref<6x2x200xf32, #tpu.memory_space<vmem>>, vector<1x2x200xf32>
    %91 = vector.shape_cast %90 : vector<1x2x200xf32> to vector<2x200xf32>
    %92 = vector.shape_cast %89 : vector<2x200xf32> to vector<1x2x200xf32>
    tpu.vector_store %arg3[%c5_55, %c0_56, %c0_57], %92 {strides = array<i32>} : memref<6x2x200xf32, #tpu.memory_space<vmem>>, vector<1x2x200xf32>,
    return
  }
}

</mosaic_0001>

<bundles_post_ra>
// kernel: tpu_custom_call.1
= control target key start
LH: loop header
LB: loop body
LE: loop exit
PB: predicated region body
PF: predicated region fallthrough
CT: control target
= control target key end

     0   :  { %v1880_v3 = vmov 0.0|0.0   ;;  %vm1881_vm0 = vmmov 0   ;;  %v1882_v6 = vmov 0.0   ;;  %s2516_s0 = inlined_call_operand.vmem [shape: f32[2,105], index: 0, kind: input, shape index: {}]   ;;  %s2517_s1 = inlined_call_operand.vmem [shape: f32[6,105,100], index: 1, kind: input, shape index: {}]   ;;  %s2518_s2 = inlined_call_operand.vmem [shape: f32[101,200], index: 2, kind: input, shape index: {}]   ;;  %s2519_s3 = inlined_call_operand.hbm [shape: f32[6,2,200], index: 3, kind: output, shape index: {}]  }
   0x1   :  { %v44_v0 = vld [vmem:[%s2517_s1] sm:$0xff]  ;;  %v45_v1 = vld [vmem:[%s2517_s1 + $0x8] sm:$0xff]  ;;  %v46_v2 = vld [vmem:[%s2517_s1 + $0x10] sm:$0xff]  ;;  %1548 = vmatprep.subr.bf16.mxu0 %v1880_v3  ;;  %1390 = vmatprep.mubr.msk.f32.mxu0 %vm1881_vm0, %v1882_v6 }
   0x2   :  { %v1549_v4 = vpack.c.bf16 %v45_v1, %v44_v0  ;;  %v47_v5 = vld [vmem:[%s2517_s1 + $0x18] sm:$0xff]  ;;  %228 = vmatprep.mubr.f32.mxu1 %v1882_v6  ;;  %v48_v8 = vld [vmem:[%s2517_s1 + $0x20] sm:$0xff]  ;;  %v49_v9 = vld [vmem:[%s2517_s1 + $0x28] sm:$0xff] }
   0x3   :  { %v1552_v7 = vpack.c.bf16 %v47_v5, %v46_v2 }
   0x4   :  { %1550 = vmatpush3.bf16.msra.mxu0 %v1549_v4 }
   0x5   :  { %1551 = vmatprep.subr.bf16.mxu0 %v1880_v3 }
   0x6   :  { %8 = vsyncpa [#allocation3], 0  ;;  %v1555_v10 = vpack.c.bf16 %v49_v9, %v48_v8  ;;  %v50_v11 = vld [vmem:[%s2517_s1 + $0x30] sm:$0xff]  ;;  %v51_v12 = vld [vmem:[%s2517_s1 + $0x38] sm:$0xff]  ;;  %vm62_vm1 = vcmask 1040384   ;;  %vm1883_vm2 = vmmov 1  }
   0x7   :  { %v1558_v13 = vpack.c.bf16 %v51_v12, %v50_v11  ;;  %v52_v14 = vld [vmem:[%s2517_s1 + $0x40] sm:$0xff]  ;;  %v53_v15 = vld [vmem:[%s2517_s1 + $0x48] sm:$0xff]  ;;  %v54_v17 = vld [vmem:[%s2517_s1 + $0x50] sm:$0xff]  ;;  %vm58_vm4 = vcmask 859136   ;;  %vm157_vm5 = vcmask 1043456   ;;  %vm153_vm6 = vcmask 818176  }
   0x8   :  { %1553 = vmatpush3.bf16.msra.mxu0 %v1552_v7  ;;  %v1561_v16 = vpack.c.bf16 %v53_v15, %v52_v14  ;;  %v55_v18 = vld [vmem:[%s2517_s1 + $0x58] sm:$0xff]  ;;  %v56_v20 = vld [vmem:[%s2517_s1 + $0x60] sm:$0xff]  ;;  %v57_v21 = vld [vmem:[%s2517_s1 + $0x68] sm:$0x1]  ;;  %vm246_vm7 = vcmask 1041408   ;;  %vm247_vm8 = vcmask 584706  }
   0x9   :  { %1554 = vmatprep.subr.bf16.mxu0 %v1880_v3  ;;  %v1564_v19 = vpack.c.bf16 %v55_v18, %v54_v17  ;;  %v1567_v22 = vpack.c.bf16 %v57_v21, %v56_v20  ;;  %vm1960_vm3 = vmpackc.low %vm62_vm1, %vm1883_vm2  ;;  %v1969_v24 = vld [vmem:[%s2516_s0] sm:$0x3]  ;;  %v17_v25 = vld [vmem:[%s2518_s2 + $0x8] sm:$0xff] }
   0xa   :  { %v19_v26 = vld [vmem:[%s2518_s2 + $0x18] sm:$0xff]  ;;  %v16_v28 = vld [vmem:[%s2518_s2] sm:$0xff]  ;;  %v18_v29 = vld [vmem:[%s2518_s2 + $0x10] sm:$0xff] }
   0xb   :  { %v1980_v27 = vpack.c.bf16 %v19_v26, %v17_v25  ;;  %v1988_v30 = vpack.c.bf16 %v18_v29, %v16_v28  ;;  %v21_v31 = vld [vmem:[%s2518_s2 + $0x28] sm:$0xff]  ;;  %v23_v32 = vld [vmem:[%s2518_s2 + $0x38] sm:$0xff]  ;;  %v20_v34 = vld [vmem:[%s2518_s2 + $0x20] sm:$0xff] }
   0xc   :  { %1556 = vmatpush3.bf16.msra.mxu0 %v1555_v10  ;;  %v2000_v33 = vpack.c.bf16 %v23_v32, %v21_v31  ;;  %v22_v35 = vld [vmem:[%s2518_s2 + $0x30] sm:$0xff]  ;;  %v25_v37 = vld [vmem:[%s2518_s2 + $0x48] sm:$0xff]  ;;  %v27_v38 = vld [vmem:[%s2518_s2 + $0x58] sm:$0xff] }
   0xd   :  { %1557 = vmatprep.subr.bf16.mxu0 %v1880_v3  ;;  %1571 = vmatprep.subr.bf16.mxu1 %v1980_v27  ;;  %v2008_v36 = vpack.c.bf16 %v22_v35, %v20_v34  ;;  %v2020_v39 = vpack.c.bf16 %v27_v38, %v25_v37  ;;  %v24_v40 = vld [vmem:[%s2518_s2 + $0x40] sm:$0xff]  ;;  %v26_v41 = vld [vmem:[%s2518_s2 + $0x50] sm:$0xff]  ;;  %v29_v43 = vld [vmem:[%s2518_s2 + $0x68] sm:$0xff]  ;;  %v143_v35 = vlaneseq }
   0xe   :  { %1573 = vmatpush1.bf16.msra.mxu1 %v1988_v30  ;;  %v2028_v42 = vpack.c.bf16 %v26_v41, %v24_v40  ;;  %v31_v44 = vld [vmem:[%s2518_s2 + $0x78] sm:$0xff]  ;;  %v28_v46 = vld [vmem:[%s2518_s2 + $0x60] sm:$0xff]  ;;  %v30_v47 = vld [vmem:[%s2518_s2 + $0x70] sm:$0xff] }
   0xf   :  { %1575 = vmatprep.subr.bf16.mxu1 %v2000_v33  ;;  %v2040_v45 = vpack.c.bf16 %v31_v44, %v29_v43  ;;  %v2048_v48 = vpack.c.bf16 %v30_v47, %v28_v46  ;;  %v33_v49 = vld [vmem:[%s2518_s2 + $0x88] sm:$0xff]  ;;  %v35_v50 = vld [vmem:[%s2518_s2 + $0x98] sm:$0xff]  ;;  %v32_v52 = vld [vmem:[%s2518_s2 + $0x80] sm:$0xff]  ;;  %v144_v37 = vshrl.u32 %v143_v35, 7  ;;  %v1884_v43 = vmov 1983009808  }
  0x10   :  { %1559 = vmatpush3.bf16.msra.mxu0 %v1558_v13  ;;  %v2060_v51 = vpack.c.bf16 %v35_v50, %v33_v49  ;;  %v34_v53 = vld [vmem:[%s2518_s2 + $0x90] sm:$0xff]  ;;  %v37_v55 = vld [vmem:[%s2518_s2 + $0xa8] sm:$0xff]  ;;  %v39_v56 = vld [vmem:[%s2518_s2 + $0xb8] sm:$0xff]  ;;  %v239_v44 = vunpack.c.l.s4 %v1884_v43 }
  0x11   :  { %1560 = vmatprep.subr.bf16.mxu0 %v1880_v3  ;;  %v2068_v54 = vpack.c.bf16 %v34_v53, %v32_v52  ;;  %v2080_v57 = vpack.c.bf16 %v39_v56, %v37_v55  ;;  %v36_v58 = vld [vmem:[%s2518_s2 + $0xa0] sm:$0xff]  ;;  %v38_v59 = vld [vmem:[%s2518_s2 + $0xb0] sm:$0xff]  ;;  %v2097_v61 = vld [vmem:[%s2518_s2 + $0xc8] sm:$0xf]  ;;  %v145_v38 = vsub.s32 0, %v144_v37  ;;  %v149_v41 = vsub.s32 1, %v144_v37 }
  0x12   :  { %1577 = vmatpush1.bf16.msra.mxu1 %v2008_v36  ;;  %v2088_v60 = vpack.c.bf16 %v38_v59, %v36_v58  ;;  %v2104_v62 = vld [vmem:[%s2518_s2 + $0xc0] sm:$0xf]  ;;  %v1177_v7 = vld [vmem:[%s2517_s1 + $0x70] sm:$0xff]  ;;  %v1178_v8 = vld [vmem:[%s2517_s1 + $0x78] sm:$0xff]  ;;  %v240_v49 = vunpack.c.0.s8 %v239_v44 }
  0x13   :  { %1579 = vmatprep.subr.bf16.mxu1 %v2020_v39  ;;  %v1595_v10 = vpack.c.bf16 %v1178_v8, %v1177_v7  ;;  %v1179_v12 = vld [vmem:[%s2517_s1 + $0x80] sm:$0xff]  ;;  %v1180_v13 = vld [vmem:[%s2517_s1 + $0x88] sm:$0xff]  ;;  %v1181_v15 = vld [vmem:[%s2517_s1 + $0x90] sm:$0xff] }
  0x14   :  { %1562 = vmatpush3.bf16.msra.mxu0 %v1561_v16  ;;  %v1598_v14 = vpack.c.bf16 %v1180_v13, %v1179_v12  ;;  %v1182_v16 = vld [vmem:[%s2517_s1 + $0x98] sm:$0xff]  ;;  %v1183_v18 = vld [vmem:[%s2517_s1 + $0xa0] sm:$0xff]  ;;  %v1185_v21 = vld [vmem:[%s2517_s1 + $0xb0] sm:$0xff]  ;;  %v2196_v56 = vsub.s32 %v240_v49, %v144_v37 }
  0x15   :  { %1563 = vmatprep.subr.bf16.mxu0 %v1880_v3  ;;  %v1601_v17 = vpack.c.bf16 %v1182_v16, %v1181_v15  ;;  %v1187_v26 = vld [vmem:[%s2517_s1 + $0xc0] sm:$0xff]  ;;  %v1188_v28 = vld [vmem:[%s2517_s1 + $0xc8] sm:$0xff]  ;;  %v1189_v31 = vld [vmem:[%s2517_s1 + $0xd0] sm:$0xff] }
  0x16   :  { %1581 = vmatpush1.bf16.msra.mxu1 %v2028_v42  ;;  %v1610_v29 = vpack.c.bf16 %v1188_v28, %v1187_v26  ;;  %v1190_v32 = vld [vmem:[%s2517_s1 + $0xd8] sm:$0x1]  ;;  %v1171_v40 = vld [vmem:[%s2518_s2 + $0xc4] ss:$8 sm:$0x3]  ;;  %vm2198_vm9 = vmor %vm247_vm8, %vm246_vm7 }
  0x17   :  { %1583 = vmatprep.subr.bf16.mxu1 %v2040_v45  ;;  %v1613_v34 = vpack.c.bf16 %v1190_v32, %v1189_v31  ;;  %v2190_v46 = vrot.slane %v1171_v40, %v145_v38  ;;  %v2192_v47 = vrot.slane %v1171_v40, %v149_v41  ;;  %v1196_v8 = vld [vmem:[%s2517_s1 + $0xe0] sm:$0xff]  ;;  %v1198_v13 = vld [vmem:[%s2517_s1 + $0xf0] sm:$0xff] }
  0x18   :  { %1565 = vmatpush3.bf16.msra.mxu0 %v1564_v19  ;;  %v1184_v19 = vld [vmem:[%s2517_s1 + $0xa8] sm:$0xff]  ;;  %v1200_v16 = vld [vmem:[%s2517_s1 + $0x100] sm:$0xff]  ;;  %v1206_v28 = vld [vmem:[%s2517_s1 + $0x130] sm:$0xff] }
  0x19   :  { %1566 = vmatprep.subr.bf16.mxu0 %v1880_v3  ;;  %v1604_v20 = vpack.c.bf16 %v1184_v19, %v1183_v18  ;;  %v1202_v19 = vld [vmem:[%s2517_s1 + $0x110] sm:$0xff]  ;;  %v1208_v32 = vld [vmem:[%s2517_s1 + $0x140] sm:$0xff] }
  0x1a   :  { %1585 = vmatpush1.bf16.msra.mxu1 %v2048_v48 }
  0x1b   :  { %1587 = vmatprep.subr.bf16.mxu1 %v2060_v51 }
  0x1c   :  { %1569 = vmatpush3.bf16.msk.msra.mxu0 %vm1960_vm3, %v1567_v22  ;;  %v1186_v22 = vld [vmem:[%s2517_s1 + $0xb8] sm:$0xff] }
  0x1d   :  { %1617 = vmatprep.subr.bf16.mxu0 %v1980_v27  ;;  %v1607_v25 = vpack.c.bf16 %v1186_v22, %v1185_v21  ;;  %v1204_v22 = vld [vmem:[%s2517_s1 + $0x120] sm:$0xff] }
  0x1e   :  { %1589 = vmatpush1.bf16.msra.mxu1 %v2068_v54 }
  0x1f   :  { %1391 = vmatmul.mubr.msk.f32.vlgmr.msra.gmra.mrb[0].mxu0 %vm58_vm4, %v1969_v24  ;;  %1591 = vmatprep.subr.bf16.mxu1 %v2080_v57 }
  0x20   :  { %411 = vmatprep.mubr.f32.mxu0 %v1882_v6  ;;  %1619 = vmatpush1.bf16.msra.mxu0 %v1988_v30 }
  0x21   :  { %1621 = vmatprep.subr.bf16.mxu0 %v2000_v33 }
  0x22   :  { %1593 = vmatpush1.bf16.msra.mxu1 %v2088_v60 }
  0x23   :  { %1174 = vmatprep.subr.msk.mxu1 %vm157_vm5, %v2097_v61 }
  0x24   :  { %1623 = vmatpush1.bf16.msra.mxu0 %v2008_v36 }
  0x25   :  { %1625 = vmatprep.subr.bf16.mxu0 %v2020_v39 }
  0x26   :  { %1175 = vmatpush1.msk.msra.mxu1 %vm157_vm5, %v2104_v62 }
  0x27   :  { %1594 = vmatprep.subr.bf16.mxu1 %v1880_v3 }
  0x28   :  { %1627 = vmatpush1.bf16.msra.mxu0 %v2028_v42 }
  0x29   :  { %1629 = vmatprep.subr.bf16.mxu0 %v2040_v45 }
  0x2c   :  { %1631 = vmatpush1.bf16.msra.mxu0 %v2048_v48 }
  0x2d   :  { %1633 = vmatprep.subr.bf16.mxu0 %v2060_v51 }
  0x30   :  { %1635 = vmatpush1.bf16.msra.mxu0 %v2068_v54 }
  0x31   :  { %1637 = vmatprep.subr.bf16.mxu0 %v2080_v57 }
  0x34   :  { %1639 = vmatpush1.bf16.msra.mxu0 %v2088_v60 }
  0x35   :  { %1193 = vmatprep.subr.msk.mxu0 %vm157_vm5, %v2097_v61 }
  0x38   :  { %1194 = vmatpush1.msk.msra.mxu0 %vm157_vm5, %v2104_v62 }
  0x39   :  { %1640 = vmatprep.subr.bf16.mxu0 %v1880_v3 }
  0xf2   :  { %v132_v63 = vpop.f32.mrb[0].mxu0 }
  0xf3   :  { %v136_v0 = vsub.f32 0.0, %v132_v63  ;;  %v1392_v1 = vpop.f32.mrb[1].mxu0 }
  0xf5   :  { %v137_v2 = vmul.f32 1.442695, %v136_v0 }
  0xf7   :  { %1832 = vpow2.f32 %v137_v2 }
 0x101   :  { %v1833_v4 = vpop.eup %1832 }
 0x102   :  { %v139_v5 = vadd.f32 1.0, %v1833_v4 }
 0x104   :  { %1834 = vrcp.f32 %v139_v5 }
 0x10e   :  { %v1835_v9 = vpop.eup %1834 }
 0x10f   :  { %v141_v11 = vmul.f32 %v1835_v9, %v132_v63  ;;  %v1197_v9 = vld [vmem:[%s2517_s1 + $0xe8] sm:$0xff] }
 0x111   :  { %1176 = vmatmul.mubr.msk.f32.vlgmr.msra.gmra.mrb[0].mxu1 %vm153_vm6, %v141_v11  ;;  %v1641_v11 = vpack.c.bf16 %v1197_v9, %v1196_v8  ;;  %v1219_v9 = vld [vmem:[%s2517_s1 + $0x170] sm:$0xff] }
 0x112   :  { %1596 = vmatpush3.bf16.msra.mxu1 %v1595_v10  ;;  %1421 = vmatprep.mubr.msk.f32.mxu1 %vm1881_vm0, %v1882_v6 }
 0x113   :  { %1597 = vmatprep.subr.bf16.mxu1 %v1880_v3 }
 0x116   :  { %1599 = vmatpush3.bf16.msra.mxu1 %v1598_v14  ;;  %v1199_v14 = vld [vmem:[%s2517_s1 + $0xf8] sm:$0xff] }
 0x117   :  { %1600 = vmatprep.subr.bf16.mxu1 %v1880_v3  ;;  %v1644_v15 = vpack.c.bf16 %v1199_v14, %v1198_v13  ;;  %v1222_v13 = vld [vmem:[%s2517_s1 + $0x188] sm:$0xff] }
 0x11a   :  { %1602 = vmatpush3.bf16.msra.mxu1 %v1601_v17  ;;  %v1201_v17 = vld [vmem:[%s2517_s1 + $0x108] sm:$0xff] }
 0x11b   :  { %1603 = vmatprep.subr.bf16.mxu1 %v1880_v3  ;;  %v1647_v18 = vpack.c.bf16 %v1201_v17, %v1200_v16  ;;  %v1224_v16 = vld [vmem:[%s2517_s1 + $0x198] sm:$0xff] }
 0x11e   :  { %1605 = vmatpush3.bf16.msra.mxu1 %v1604_v20  ;;  %v1203_v20 = vld [vmem:[%s2517_s1 + $0x118] sm:$0xff] }
 0x11f   :  { %1606 = vmatprep.subr.bf16.mxu1 %v1880_v3  ;;  %v1650_v21 = vpack.c.bf16 %v1203_v20, %v1202_v19  ;;  %v1226_v19 = vld [vmem:[%s2517_s1 + $0x1a8] sm:$0xff] }
 0x122   :  { %1608 = vmatpush3.bf16.msra.mxu1 %v1607_v25  ;;  %v1205_v25 = vld [vmem:[%s2517_s1 + $0x128] sm:$0xff] }
 0x123   :  { %1609 = vmatprep.subr.bf16.mxu1 %v1880_v3  ;;  %v1653_v26 = vpack.c.bf16 %v1205_v25, %v1204_v22  ;;  %v1228_v22 = vld [vmem:[%s2517_s1 + $0x1b8] sm:$0x1] }
 0x126   :  { %1611 = vmatpush3.bf16.msra.mxu1 %v1610_v29  ;;  %v1207_v29 = vld [vmem:[%s2517_s1 + $0x138] sm:$0xff] }
 0x127   :  { %1612 = vmatprep.subr.bf16.mxu1 %v1880_v3  ;;  %v1656_v31 = vpack.c.bf16 %v1207_v29, %v1206_v28 }
 0x12a   :  { %1615 = vmatpush3.bf16.msk.msra.mxu1 %vm1960_vm3, %v1613_v34  ;;  %v1209_v34 = vld [vmem:[%s2517_s1 + $0x148] sm:$0x1] }
 0x12b   :  { %1663 = vmatprep.subr.bf16.mxu1 %v1980_v27  ;;  %v1659_v35 = vpack.c.bf16 %v1209_v34, %v1208_v32 }
 0x12d   :  { %1422 = vmatmul.mubr.msk.f32.vlgmr.msra.gmra.mrb[2].mxu1 %vm58_vm4, %v1969_v24 }
 0x12e   :  { %1665 = vmatpush1.bf16.msra.mxu1 %v1988_v30  ;;  %592 = vmatprep.mubr.f32.mxu1 %v1882_v6 }
 0x12f   :  { %1667 = vmatprep.subr.bf16.mxu1 %v2000_v33 }
 0x132   :  { %1669 = vmatpush1.bf16.msra.mxu1 %v2008_v36 }
 0x133   :  { %1671 = vmatprep.subr.bf16.mxu1 %v2020_v39 }
 0x136   :  { %1673 = vmatpush1.bf16.msra.mxu1 %v2028_v42 }
 0x137   :  { %1675 = vmatprep.subr.bf16.mxu1 %v2040_v45 }
 0x13a   :  { %1677 = vmatpush1.bf16.msra.mxu1 %v2048_v48 }
 0x13b   :  { %1679 = vmatprep.subr.bf16.mxu1 %v2060_v51 }
 0x13e   :  { %1681 = vmatpush1.bf16.msra.mxu1 %v2068_v54 }
 0x13f   :  { %1683 = vmatprep.subr.bf16.mxu1 %v2080_v57 }
 0x142   :  { %1685 = vmatpush1.bf16.msra.mxu1 %v2088_v60 }
 0x143   :  { %1212 = vmatprep.subr.msk.mxu1 %vm157_vm5, %v2097_v61 }
 0x146   :  { %1213 = vmatpush1.msk.msra.mxu1 %vm157_vm5, %v2104_v62 }
 0x147   :  { %1686 = vmatprep.subr.bf16.mxu1 %v1880_v3 }
 0x1e4   :  { %v230_v50 = vpop.f32.mrb[0].mxu1 }
 0x1e5   :  { %v231_v52 = vadd.f32 %v230_v50, %v2190_v46  ;;  %v232_v53 = vpop.f32.mrb[1].mxu1 }
 0x1e6   :  { %v233_v55 = vadd.f32 %v232_v53, %v2192_v47 }
 0x1e8   :  { %v237_v58 = vcombine.low %v231_v52, %v233_v55 }
 0x1ea   :  { %v244_v63 = vrot.slane %v237_v58, %v2196_v56 }
 0x1ec   :  { %249 = vst.msk [vmem:[#allocation2] sm:$0xf] %vm2198_vm9, %v244_v63  ;;  %v1215_v63 = vld [vmem:[%s2517_s1 + $0x150] sm:$0xff] }
 0x200   :  { %v334_v0 = vpop.f32.mrb[2].mxu1 }
 0x201   :  { %v338_v1 = vsub.f32 0.0, %v334_v0  ;;  %v1423_v2 = vpop.f32.mrb[3].mxu1 }
 0x203   :  { %v339_v4 = vmul.f32 1.442695, %v338_v1 }
 0x205   :  { %1836 = vpow2.f32 %v339_v4 }
 0x20f   :  { %v1837_v5 = vpop.eup %1836 }
 0x210   :  { %v341_v7 = vadd.f32 1.0, %v1837_v5  ;;  %v1217_v5 = vld [vmem:[%s2517_s1 + $0x160] sm:$0xff] }
 0x212   :  { %1838 = vrcp.f32 %v341_v7  ;;  %v1218_v7 = vld [vmem:[%s2517_s1 + $0x168] sm:$0xff] }
 0x213   :  { %v1690_v8 = vpack.c.bf16 %v1218_v7, %v1217_v5  ;;  %v1241_v5 = vld [vmem:[%s2517_s1 + $0x1f8] sm:$0xff] }
 0x21c   :  { %v1839_v10 = vpop.eup %1838 }
 0x21d   :  { %v343_v12 = vmul.f32 %v1839_v10, %v334_v0  ;;  %v1216_v0 = vld [vmem:[%s2517_s1 + $0x158] sm:$0xff] }
 0x21e   :  { %v1687_v2 = vpack.c.bf16 %v1216_v0, %v1215_v63  ;;  %v1220_v10 = vld [vmem:[%s2517_s1 + $0x178] sm:$0xff]  ;;  %v1238_v0 = vld [vmem:[%s2517_s1 + $0x1e0] sm:$0xff] }
 0x21f   :  { %1195 = vmatmul.mubr.msk.f32.vlgmr.msra.gmra.mrb[2].mxu0 %vm153_vm6, %v343_v12  ;;  %v1221_v12 = vld [vmem:[%s2517_s1 + $0x180] sm:$0xff] }
 0x220   :  { %1642 = vmatpush3.bf16.msra.mxu0 %v1641_v11  ;;  %1452 = vmatprep.mubr.msk.f32.mxu0 %vm1881_vm0, %v1882_v6  ;;  %v1693_v11 = vpack.c.bf16 %v1220_v10, %v1219_v9  ;;  %v1696_v14 = vpack.c.bf16 %v1222_v13, %v1221_v12  ;;  %v1243_v9 = vld [vmem:[%s2517_s1 + $0x208] sm:$0xff]  ;;  %v1245_v12 = vld [vmem:[%s2517_s1 + $0x218] sm:$0xff] }
 0x221   :  { %1643 = vmatprep.subr.bf16.mxu0 %v1880_v3 }
 0x224   :  { %1645 = vmatpush3.bf16.msra.mxu0 %v1644_v15  ;;  %v1223_v15 = vld [vmem:[%s2517_s1 + $0x190] sm:$0xff] }
 0x225   :  { %1646 = vmatprep.subr.bf16.mxu0 %v1880_v3  ;;  %v1699_v17 = vpack.c.bf16 %v1224_v16, %v1223_v15  ;;  %v1247_v15 = vld [vmem:[%s2517_s1 + $0x228] sm:$0x1] }
 0x228   :  { %1648 = vmatpush3.bf16.msra.mxu0 %v1647_v18  ;;  %v1225_v18 = vld [vmem:[%s2517_s1 + $0x1a0] sm:$0xff] }
 0x229   :  { %1649 = vmatprep.subr.bf16.mxu0 %v1880_v3  ;;  %v1702_v20 = vpack.c.bf16 %v1226_v19, %v1225_v18 }
 0x22c   :  { %1651 = vmatpush3.bf16.msra.mxu0 %v1650_v21  ;;  %v1227_v21 = vld [vmem:[%s2517_s1 + $0x1b0] sm:$0xff] }
 0x22d   :  { %1652 = vmatprep.subr.bf16.mxu0 %v1880_v3  ;;  %v1705_v25 = vpack.c.bf16 %v1228_v22, %v1227_v21  ;;  %v1256_v21 = vld [vmem:[%s2517_s1 + $0x248] sm:$0xff] }
 0x230   :  { %1654 = vmatpush3.bf16.msra.mxu0 %v1653_v26 }
 0x231   :  { %1655 = vmatprep.subr.bf16.mxu0 %v1880_v3 }
 0x234   :  { %1657 = vmatpush3.bf16.msra.mxu0 %v1656_v31 }
 0x235   :  { %1658 = vmatprep.subr.bf16.mxu0 %v1880_v3 }
 0x238   :  { %1661 = vmatpush3.bf16.msk.msra.mxu0 %vm1960_vm3, %v1659_v35 }
 0x239   :  { %1709 = vmatprep.subr.bf16.mxu0 %v1980_v27 }
 0x23b   :  { %1453 = vmatmul.mubr.msk.f32.vlgmr.msra.gmra.mrb[4].mxu0 %vm58_vm4, %v1969_v24 }
 0x23c   :  { %1711 = vmatpush1.bf16.msra.mxu0 %v1988_v30  ;;  %773 = vmatprep.mubr.f32.mxu0 %v1882_v6 }
 0x23d   :  { %1713 = vmatprep.subr.bf16.mxu0 %v2000_v33 }
 0x240   :  { %1715 = vmatpush1.bf16.msra.mxu0 %v2008_v36 }
 0x241   :  { %1717 = vmatprep.subr.bf16.mxu0 %v2020_v39 }
 0x244   :  { %1719 = vmatpush1.bf16.msra.mxu0 %v2028_v42 }
 0x245   :  { %1721 = vmatprep.subr.bf16.mxu0 %v2040_v45 }
 0x248   :  { %1723 = vmatpush1.bf16.msra.mxu0 %v2048_v48 }
 0x249   :  { %1725 = vmatprep.subr.bf16.mxu0 %v2060_v51 }
 0x24c   :  { %1727 = vmatpush1.bf16.msra.mxu0 %v2068_v54 }
 0x24d   :  { %1729 = vmatprep.subr.bf16.mxu0 %v2080_v57 }
 0x250   :  { %1731 = vmatpush1.bf16.msra.mxu0 %v2088_v60 }
 0x251   :  { %1231 = vmatprep.subr.msk.mxu0 %vm157_vm5, %v2097_v61 }
 0x254   :  { %1232 = vmatpush1.msk.msra.mxu0 %vm157_vm5, %v2104_v62 }
 0x255   :  { %1732 = vmatprep.subr.bf16.mxu0 %v1880_v3 }
 0x2f2   :  { %v413_v37 = vpop.f32.mrb[2].mxu0 }
 0x2f3   :  { %v414_v38 = vadd.f32 %v413_v37, %v2190_v46  ;;  %v415_v40 = vpop.f32.mrb[3].mxu0 }
 0x2f4   :  { %v416_v41 = vadd.f32 %v415_v40, %v2192_v47 }
 0x2f6   :  { %v420_v43 = vcombine.low %v414_v38, %v416_v41 }
 0x2f8   :  { %v427_v44 = vrot.slane %v420_v43, %v2196_v56 }
 0x2fa   :  { %430 = vst.msk [vmem:[#allocation2 + $0x4] sm:$0xf] %vm2198_vm9, %v427_v44  ;;  %v1234_v44 = vld [vmem:[%s2517_s1 + $0x1c0] sm:$0xff] }
 0x30e   :  { %v515_v49 = vpop.f32.mrb[4].mxu0 }
 0x30f   :  { %v519_v50 = vsub.f32 0.0, %v515_v49  ;;  %v1454_v52 = vpop.f32.mrb[5].mxu0 }
 0x311   :  { %v520_v53 = vmul.f32 1.442695, %v519_v50 }
 0x313   :  { %1840 = vpow2.f32 %v520_v53 }
 0x31d   :  { %v1841_v55 = vpop.eup %1840 }
 0x31e   :  { %v522_v58 = vadd.f32 1.0, %v1841_v55  ;;  %v1236_v55 = vld [vmem:[%s2517_s1 + $0x1d0] sm:$0xff] }
 0x320   :  { %1842 = vrcp.f32 %v522_v58  ;;  %v1237_v58 = vld [vmem:[%s2517_s1 + $0x1d8] sm:$0xff] }
 0x321   :  { %v1736_v63 = vpack.c.bf16 %v1237_v58, %v1236_v55 }
 0x32a   :  { %v1843_v1 = vpop.eup %1842 }
 0x32b   :  { %v524_v4 = vmul.f32 %v1843_v1, %v515_v49  ;;  %v1235_v49 = vld [vmem:[%s2517_s1 + $0x1c8] sm:$0xff] }
 0x32c   :  { %v1733_v52 = vpack.c.bf16 %v1235_v49, %v1234_v44  ;;  %v1239_v1 = vld [vmem:[%s2517_s1 + $0x1e8] sm:$0xff] }
 0x32d   :  { %1214 = vmatmul.mubr.msk.f32.vlgmr.msra.gmra.mrb[4].mxu1 %vm153_vm6, %v524_v4  ;;  %v1240_v4 = vld [vmem:[%s2517_s1 + $0x1f0] sm:$0xff] }
 0x32e   :  { %1688 = vmatpush3.bf16.msra.mxu1 %v1687_v2  ;;  %1483 = vmatprep.mubr.msk.f32.mxu1 %vm1881_vm0, %v1882_v6  ;;  %v1739_v2 = vpack.c.bf16 %v1239_v1, %v1238_v0  ;;  %v1742_v7 = vpack.c.bf16 %v1241_v5, %v1240_v4 }
 0x32f   :  { %1689 = vmatprep.subr.bf16.mxu1 %v1880_v3 }
 0x332   :  { %1691 = vmatpush3.bf16.msra.mxu1 %v1690_v8  ;;  %v1242_v8 = vld [vmem:[%s2517_s1 + $0x200] sm:$0xff] }
 0x333   :  { %1692 = vmatprep.subr.bf16.mxu1 %v1880_v3  ;;  %v1745_v10 = vpack.c.bf16 %v1243_v9, %v1242_v8 }
 0x336   :  { %1694 = vmatpush3.bf16.msra.mxu1 %v1693_v11  ;;  %v1244_v11 = vld [vmem:[%s2517_s1 + $0x210] sm:$0xff] }
 0x337   :  { %1695 = vmatprep.subr.bf16.mxu1 %v1880_v3  ;;  %v1748_v13 = vpack.c.bf16 %v1245_v12, %v1244_v11 }
 0x33a   :  { %1697 = vmatpush3.bf16.msra.mxu1 %v1696_v14  ;;  %v1246_v14 = vld [vmem:[%s2517_s1 + $0x220] sm:$0xff] }
 0x33b   :  { %1698 = vmatprep.subr.bf16.mxu1 %v1880_v3  ;;  %v1751_v16 = vpack.c.bf16 %v1247_v15, %v1246_v14 }
 0x33e   :  { %1700 = vmatpush3.bf16.msra.mxu1 %v1699_v17 }
 0x33f   :  { %1701 = vmatprep.subr.bf16.mxu1 %v1880_v3 }
 0x342   :  { %1703 = vmatpush3.bf16.msra.mxu1 %v1702_v20  ;;  %v1255_v20 = vld [vmem:[%s2517_s1 + $0x240] sm:$0xff] }
 0x343   :  { %1704 = vmatprep.subr.bf16.mxu1 %v1880_v3  ;;  %v1782_v22 = vpack.c.bf16 %v1256_v21, %v1255_v20 }
 0x346   :  { %1707 = vmatpush3.bf16.msk.msra.mxu1 %vm1960_vm3, %v1705_v25  ;;  %v1257_v25 = vld [vmem:[%s2517_s1 + $0x250] sm:$0xff] }
 0x347   :  { %1755 = vmatprep.subr.bf16.mxu1 %v1980_v27 }
 0x349   :  { %1484 = vmatmul.mubr.msk.f32.vlgmr.msra.gmra.mrb[6].mxu1 %vm58_vm4, %v1969_v24 }
 0x34a   :  { %1757 = vmatpush1.bf16.msra.mxu1 %v1988_v30  ;;  %954 = vmatprep.mubr.f32.mxu1 %v1882_v6 }
 0x34b   :  { %1759 = vmatprep.subr.bf16.mxu1 %v2000_v33 }
 0x34e   :  { %1761 = vmatpush1.bf16.msra.mxu1 %v2008_v36 }
 0x34f   :  { %1763 = vmatprep.subr.bf16.mxu1 %v2020_v39 }
 0x352   :  { %1765 = vmatpush1.bf16.msra.mxu1 %v2028_v42 }
 0x353   :  { %1767 = vmatprep.subr.bf16.mxu1 %v2040_v45 }
 0x356   :  { %1769 = vmatpush1.bf16.msra.mxu1 %v2048_v48 }
 0x357   :  { %1771 = vmatprep.subr.bf16.mxu1 %v2060_v51 }
 0x35a   :  { %1773 = vmatpush1.bf16.msra.mxu1 %v2068_v54 }
 0x35b   :  { %1775 = vmatprep.subr.bf16.mxu1 %v2080_v57 }
 0x35e   :  { %1777 = vmatpush1.bf16.msra.mxu1 %v2088_v60 }
 0x35f   :  { %1250 = vmatprep.subr.msk.mxu1 %vm157_vm5, %v2097_v61 }
 0x362   :  { %1251 = vmatpush1.msk.msra.mxu1 %vm157_vm5, %v2104_v62 }
 0x363   :  { %1778 = vmatprep.subr.bf16.mxu1 %v1880_v3 }
 0x400   :  { %v594_v26 = vpop.f32.mrb[4].mxu1 }
 0x401   :  { %v595_v28 = vadd.f32 %v594_v26, %v2190_v46  ;;  %v596_v29 = vpop.f32.mrb[5].mxu1  ;;  %v1258_v26 = vld [vmem:[%s2517_s1 + $0x258] sm:$0xff] }
 0x402   :  { %v597_v31 = vadd.f32 %v596_v29, %v2192_v47  ;;  %v1259_v29 = vld [vmem:[%s2517_s1 + $0x260] sm:$0xff] }
 0x404   :  { %v601_v32 = vcombine.low %v595_v28, %v597_v31  ;;  %v1785_v28 = vpack.c.bf16 %v1258_v26, %v1257_v25 }
 0x406   :  { %v608_v34 = vrot.slane %v601_v32, %v2196_v56  ;;  %v1261_v32 = vld [vmem:[%s2517_s1 + $0x270] sm:$0xff] }
 0x408   :  { %611 = vst.msk [vmem:[#allocation2 + $0x8] sm:$0xf] %vm2198_vm9, %v608_v34  ;;  %v1262_v34 = vld [vmem:[%s2517_s1 + $0x278] sm:$0xff] }
 0x41c   :  { %v696_v35 = vpop.f32.mrb[6].mxu1 }
 0x41d   :  { %v700_v37 = vsub.f32 0.0, %v696_v35  ;;  %v1485_v38 = vpop.f32.mrb[7].mxu1 }
 0x41e   :  { %v1264_v38 = vld [vmem:[%s2517_s1 + $0x288] sm:$0xff] }
 0x41f   :  { %v701_v40 = vmul.f32 1.442695, %v700_v37  ;;  %v1263_v37 = vld [vmem:[%s2517_s1 + $0x280] sm:$0xff] }
 0x421   :  { %1844 = vpow2.f32 %v701_v40  ;;  %v1794_v40 = vpack.c.bf16 %v1264_v38, %v1263_v37 }
 0x42b   :  { %v1845_v41 = vpop.eup %1844 }
 0x42c   :  { %v703_v43 = vadd.f32 1.0, %v1845_v41  ;;  %v1265_v41 = vld [vmem:[%s2517_s1 + $0x290] sm:$0xff] }
 0x42e   :  { %1846 = vrcp.f32 %v703_v43  ;;  %v1266_v43 = vld [vmem:[%s2517_s1 + $0x298] sm:$0x1] }
 0x42f   :  { %v1797_v44 = vpack.c.bf16 %v1266_v43, %v1265_v41 }
 0x438   :  { %v1847_v50 = vpop.eup %1846 }
 0x439   :  { %v705_v53 = vmul.f32 %v1847_v50, %v696_v35  ;;  %v1791_v35 = vpack.c.bf16 %v1262_v34, %v1261_v32 }
 0x43b   :  { %1233 = vmatmul.mubr.msk.f32.vlgmr.msra.gmra.mrb[6].mxu0 %vm153_vm6, %v705_v53 }
 0x43c   :  { %1734 = vmatpush3.bf16.msra.mxu0 %v1733_v52  ;;  %1514 = vmatprep.mubr.msk.f32.mxu0 %vm1881_vm0, %v1882_v6 }
 0x43d   :  { %1735 = vmatprep.subr.bf16.mxu0 %v1880_v3 }
 0x440   :  { %1737 = vmatpush3.bf16.msra.mxu0 %v1736_v63 }
 0x441   :  { %1738 = vmatprep.subr.bf16.mxu0 %v1880_v3 }
 0x444   :  { %1740 = vmatpush3.bf16.msra.mxu0 %v1739_v2 }
 0x445   :  { %1741 = vmatprep.subr.bf16.mxu0 %v1880_v3 }
 0x448   :  { %1743 = vmatpush3.bf16.msra.mxu0 %v1742_v7 }
 0x449   :  { %1744 = vmatprep.subr.bf16.mxu0 %v1880_v3 }
 0x44c   :  { %1746 = vmatpush3.bf16.msra.mxu0 %v1745_v10 }
 0x44d   :  { %1747 = vmatprep.subr.bf16.mxu0 %v1880_v3 }
 0x450   :  { %1749 = vmatpush3.bf16.msra.mxu0 %v1748_v13 }
 0x451   :  { %1750 = vmatprep.subr.bf16.mxu0 %v1880_v3 }
 0x454   :  { %1753 = vmatpush3.bf16.msk.msra.mxu0 %vm1960_vm3, %v1751_v16 }
 0x455   :  { %1801 = vmatprep.subr.bf16.mxu0 %v1980_v27 }
 0x457   :  { %1515 = vmatmul.mubr.msk.f32.vlgmr.msra.gmra.mrb[8].mxu0 %vm58_vm4, %v1969_v24 }
 0x458   :  { %1803 = vmatpush1.bf16.msra.mxu0 %v1988_v30  ;;  %1135 = vmatprep.mubr.f32.mxu0 %v1882_v6 }
 0x459   :  { %1805 = vmatprep.subr.bf16.mxu0 %v2000_v33 }
 0x45c   :  { %1807 = vmatpush1.bf16.msra.mxu0 %v2008_v36 }
 0x45d   :  { %1809 = vmatprep.subr.bf16.mxu0 %v2020_v39 }
 0x460   :  { %1811 = vmatpush1.bf16.msra.mxu0 %v2028_v42 }
 0x461   :  { %1813 = vmatprep.subr.bf16.mxu0 %v2040_v45 }
 0x464   :  { %1815 = vmatpush1.bf16.msra.mxu0 %v2048_v48 }
 0x465   :  { %1817 = vmatprep.subr.bf16.mxu0 %v2060_v51 }
 0x468   :  { %1819 = vmatpush1.bf16.msra.mxu0 %v2068_v54 }
 0x469   :  { %1821 = vmatprep.subr.bf16.mxu0 %v2080_v57 }
 0x46c   :  { %1823 = vmatpush1.bf16.msra.mxu0 %v2088_v60 }
 0x46d   :  { %1269 = vmatprep.subr.msk.mxu0 %vm157_vm5, %v2097_v61  ;;  %v1253_v61 = vld [vmem:[%s2517_s1 + $0x230] sm:$0xff] }
 0x470   :  { %1270 = vmatpush1.msk.msra.mxu0 %vm157_vm5, %v2104_v62  ;;  %v1254_v62 = vld [vmem:[%s2517_s1 + $0x238] sm:$0xff] }
 0x471   :  { %v1779_v18 = vpack.c.bf16 %v1254_v62, %v1253_v61 }
 0x50e   :  { %v775_v27 = vpop.f32.mrb[6].mxu0 }
 0x50f   :  { %v776_v30 = vadd.f32 %v775_v27, %v2190_v46  ;;  %v777_v33 = vpop.f32.mrb[7].mxu0 }
 0x510   :  { %v778_v36 = vadd.f32 %v777_v33, %v2192_v47 }
 0x512   :  { %v782_v39 = vcombine.low %v776_v30, %v778_v36 }
 0x514   :  { %v789_v42 = vrot.slane %v782_v39, %v2196_v56 }
 0x516   :  { %792 = vst.msk [vmem:[#allocation2 + $0xc] sm:$0xf] %vm2198_vm9, %v789_v42 }
 0x52a   :  { %v877_v45 = vpop.f32.mrb[8].mxu0 }
 0x52b   :  { %v881_v48 = vsub.f32 0.0, %v877_v45  ;;  %v1516_v51 = vpop.f32.mrb[9].mxu0 }
 0x52d   :  { %v882_v54 = vmul.f32 1.442695, %v881_v48 }
 0x52f   :  { %1848 = vpow2.f32 %v882_v54 }
 0x539   :  { %v1849_v57 = vpop.eup %1848 }
 0x53a   :  { %v884_v60 = vadd.f32 1.0, %v1849_v57 }
 0x53c   :  { %1850 = vrcp.f32 %v884_v60 }
 0x546   :  { %v1851_v17 = vpop.eup %1850 }
 0x547   :  { %v886_v19 = vmul.f32 %v1851_v17, %v877_v45 }
 0x549   :  { %1252 = vmatmul.mubr.msk.f32.vlgmr.msra.gmra.mrb[8].mxu1 %vm153_vm6, %v886_v19 }
 0x54a   :  { %1780 = vmatpush3.bf16.msra.mxu1 %v1779_v18  ;;  %1545 = vmatprep.mubr.msk.f32.mxu1 %vm1881_vm0, %v1882_v6  ;;  %v1260_v6 = vld [vmem:[%s2517_s1 + $0x268] sm:$0xff]  ;;  %s1885_s1 = smov [#allocation2]  }
 0x54b   :  { %1781 = vmatprep.subr.bf16.mxu1 %v1880_v3  ;;  %v1788_v31 = vpack.c.bf16 %v1260_v6, %v1259_v29  ;;  %s1160_s9 = sshll.u32 %s1885_s1, 4  ;;  %s1161_s9 = int_to_ptr.vmem [resolvable:$true] %s1160_s9 }
 0x54c   :  { %s1856_s10 = scalar_lea.vmem %s1161_s9, 384  ;;  %p1861_p1 = scmp.lt.s32.totalorder %s1161_s9, %s1161_s9 }
 0x54d   :  { %p1857_p0 = scmp.ne.s32.totalorder %s1161_s9, %s1856_s10  ;;  %p1862_p2 = scmp.lt.s32.totalorder %s1856_s10, %s1856_s10 }
 0x54e   :  { %1783 = vmatpush3.bf16.msra.mxu1 %v1782_v22 }
 0x54f   :  { %1784 = vmatprep.subr.bf16.mxu1 %v1880_v3  ;;  %p1863_p3 = por %p1862_p2, %p1861_p1 }
 0x551   :  { %p1864_p4 = pnand %p1863_p3, %p1857_p0 }
 0x552   :  { %1786 = vmatpush3.bf16.msra.mxu1 %v1785_v28 }
 0x553   :  { %1787 = vmatprep.subr.bf16.mxu1 %v1880_v3 }
 0x556   :  { %1789 = vmatpush3.bf16.msra.mxu1 %v1788_v31 }
 0x557   :  { %1790 = vmatprep.subr.bf16.mxu1 %v1880_v3 }
 0x55a   :  { %1792 = vmatpush3.bf16.msra.mxu1 %v1791_v35 }
 0x55b   :  { %1793 = vmatprep.subr.bf16.mxu1 %v1880_v3 }
 0x55e   :  { %1795 = vmatpush3.bf16.msra.mxu1 %v1794_v40 }
 0x55f   :  { %1796 = vmatprep.subr.bf16.mxu1 %v1880_v3 }
 0x562   :  { %1799 = vmatpush3.bf16.msk.msra.mxu1 %vm1960_vm3, %v1797_v44 }
 0x565   :  { %1546 = vmatmul.mubr.msk.f32.vlgmr.msra.gmra.mrb[10].mxu1 %vm58_vm4, %v1969_v24 }
 0x61c   :  { %v956_v49 = vpop.f32.mrb[8].mxu1 }
 0x61d   :  { %v957_v50 = vadd.f32 %v956_v49, %v2190_v46  ;;  %v958_v52 = vpop.f32.mrb[9].mxu1 }
 0x61e   :  { %v959_v53 = vadd.f32 %v958_v52, %v2192_v47 }
 0x620   :  { %v963_v55 = vcombine.low %v957_v50, %v959_v53 }
 0x622   :  { %v970_v58 = vrot.slane %v963_v55, %v2196_v56 }
 0x624   :  { %973 = vst.msk [vmem:[#allocation2 + $0x10] sm:$0xf] %vm2198_vm9, %v970_v58 }
 0x638   :  { %v1058_v63 = vpop.f32.mrb[10].mxu1 }
 0x639   :  { %v1062_v3 = vsub.f32 0.0, %v1058_v63  ;;  %v1547_v0 = vpop.f32.mrb[11].mxu1 }
 0x63b   :  { %v1063_v23 = vmul.f32 1.442695, %v1062_v3 }
 0x63d   :  { %1852 = vpow2.f32 %v1063_v23 }
 0x647   :  { %v1853_v1 = vpop.eup %1852 }
 0x648   :  { %v1065_v2 = vadd.f32 1.0, %v1853_v1 }
 0x64a   :  { %1854 = vrcp.f32 %v1065_v2 }
 0x654   :  { %v1855_v24 = vpop.eup %1854 }
 0x655   :  { %v1067_v4 = vmul.f32 %v1855_v24, %v1058_v63 }
 0x657   :  { %1271 = vmatmul.mubr.msk.f32.vlgmr.msra.gmra.mrb[10].mxu0 %vm153_vm6, %v1067_v4 }
 0x72a   :  { %v1137_v5 = vpop.f32.mrb[10].mxu0 }
 0x72b   :  { %v1138_v7 = vadd.f32 %v1137_v5, %v2190_v46  ;;  %v1139_v8 = vpop.f32.mrb[11].mxu0 }
 0x72c   :  { %v1140_v9 = vadd.f32 %v1139_v8, %v2192_v47 }
 0x72e   :  { %v1144_v10 = vcombine.low %v1138_v7, %v1140_v9 }
 0x730   :  { %v1151_v11 = vrot.slane %v1144_v10, %v2196_v56 }
 0x732   :  { %1154 = vst.msk [vmem:[#allocation2 + $0x14] sm:$0xf] %vm2198_vm9, %v1151_v11 }
 0x733   :  { %1867 = shalt.err (!%p1864_p4)
}
 0x734   :  { %s1868_s2 = scalar_lea.hbm %s2519_s3, 384 }
 0x735   :  { %p1869_p5 = scmp.ne.s32.totalorder %s2519_s3, %s1868_s2  ;;  %p1872_p6 = scmp.lt.u32.totalorder %s1868_s2, %s2519_s3 }
 0x737   :  { %p1874_p7 = pnand %p1872_p6, %p1869_p5 }
 0x739   :  { %1877 = shalt.err (!%p1874_p7)
}
 0x73a   :  { %s1886_s17 = smov 64   ;;  %s1887_s18 = smov 4  }
 0x73b   :  { %1166 = dma.vmem_to_hbm [thread:$0]  %s1161_s9, 384, %s2519_s3, [#allocation3], %s1886_s17, %s1886_s17, %s1887_s18  }
 0x73c   :  { %1878 = dma.done.wait [#allocation3], 384  }
 0x73d   :  { %1879 = vsyncadd [#allocation3], 4294966912 }
 0x73e   :  { %1170 = vsyncpa [#allocation3], 1 }

</bundles_post_ra>
